<compile_context>
chip_gen: v7x
topology: tpu7x:2x2x1
jax: 0.10.0
libtpu: 0.0.40
codegen_flags: <defaults>
</compile_context>

<pallas_src>
import functools
import math

import jax
import jax.numpy as jnp
from jax.experimental import pallas as pl
from jax.experimental.pallas import tpu as pltpu

_LANE = 128
_SUBLANE = 8
# ~4 MiB HBM-facing block per array: 2 arrays x 2 buffers x 4 MiB = 16 MiB,
# safely under the raised scoped-VMEM limit on every generation
# (v5e/v6e physical 128 MiB, v7x physical 64 MiB).
_TARGET_BLOCK_BYTES = 4 * 1024 * 1024
_VMEM_LIMIT_BYTES = 40 * 1024 * 1024


def _layout(n, itemsize):
    """Pick (cols, rows, pad, row_block) for a flat lane-dense view of n elems."""
    cols, pad = None, 0
    for c in (1024, 512, 256, _LANE):
        if n % c == 0:
            cols = c
            break
    if cols is None:
        cols = _LANE
        pad = (-n) % _LANE
    rows = (n + pad) // cols
    rb = (_TARGET_BLOCK_BYTES // (cols * itemsize)) // _SUBLANE * _SUBLANE
    rb = max(_SUBLANE, rb)
    if rows <= rb:
        rb = rows  # block == full extent on the row axis (always legal)
    return cols, rows, pad, rb


def _to_2d(x_flat, cols, rows, pad):
    if pad:
        # TODO(synk): rare ragged path (n % 128 != 0) pays one pad copy of x and
        # one slice copy of y; a 1-D tail BlockSpec would remove it.
        x_flat = jnp.pad(x_flat, (0, pad))
    return x_flat.reshape(rows, cols)


def _tail_quantiles(x_flat, pcts):
    """Quantiles at pcts (high) and 1-pcts (low) via top-k: O(n), no global sort.

    Matches torch.quantile / jnp.quantile 'linear' interpolation.
    """
    n = x_flat.shape[0]
    xf = x_flat.astype(jnp.float32)
    max_tail = max(1.0 - p for p in pcts)
    k = min(n, int(math.ceil(max_tail * (n - 1))) + 2)
    top = jax.lax.top_k(xf, k)[0]        # descending: top[j] == sorted[n-1-j]
    bot = -jax.lax.top_k(-xf, k)[0]      # ascending:  bot[j] == sorted[j]
    highs, lows = [], []
    for p in pcts:
        pos = p * (n - 1)
        lo_i = int(math.floor(pos))
        f = pos - lo_i
        hi_i = min(lo_i + 1, n - 1)
        highs.append(top[n - 1 - lo_i] * (1.0 - f) + top[n - 1 - hi_i] * f)

        pos = (1.0 - p) * (n - 1)
        lo_i = int(math.floor(pos))
        f = pos - lo_i
        hi_i = min(lo_i + 1, n - 1)
        lows.append(bot[lo_i] * (1.0 - f) + bot[hi_i] * f)
    return jnp.stack(highs), jnp.stack(lows)


# ---------------------------------------------------------------------------
# Kernel 1: fused squared-error score of all 3 (new_max, new_min) candidates.
#   out[c] = sum_valid (x - qdq_c(x))**2
# ---------------------------------------------------------------------------
def _score_kernel(params_ref, x_ref, out_ref, acc_ref, *, tail_valid, needs_mask):
    i = pl.program_id(0)
    nb = pl.num_programs(0)

    @pl.when(i == 0)
    def _():
        acc_ref[...] = jnp.zeros_like(acc_ref)

    x = x_ref[...].astype(jnp.float32)
    rb, cols = x_ref.shape

    def accum(valid):
        for c in range(3):  # unrolled; params come from SMEM scalar reads
            delta = params_ref[c, 0]
            inv_delta = params_ref[c, 1]
            lo = params_ref[c, 2]
            hi = params_ref[c, 3]
            # zero-point folded: clip(round(x/delta), -zp, qmax-zp) * delta
            x_dq = jnp.clip(jnp.round(x * inv_delta), lo, hi) * delta
            diff = x - x_dq
            sq = diff * diff
            if valid is not None:
                sq = jnp.where(valid, sq, 0.0)
            acc_ref[c, :, :] += jnp.sum(sq, axis=0, keepdims=True)

    if needs_mask:
        # Fast unmasked path for all full blocks; mask only the last block.
        @pl.when(i < nb - 1)
        def _():
            accum(None)

        @pl.when(i == nb - 1)
        def _():
            # Block-local flat index (< rb*cols, fits int32 for any tensor size).
            lidx = (jax.lax.broadcasted_iota(jnp.int32, (rb, cols), 0) * cols
                    + jax.lax.broadcasted_iota(jnp.int32, (rb, cols), 1))
            accum(lidx < tail_valid)
    else:
        accum(None)

    @pl.when(i == nb - 1)
    def _():
        for c in range(3):
            out_ref[c] = jnp.sum(acc_ref[c, :, :])


def _score_sums(x2d, params, n_valid, rb):
    rows, cols = x2d.shape
    nb = pl.cdiv(rows, rb)
    needs_mask = (rows * cols != n_valid) or (rows % rb != 0)
    tail_valid = n_valid - (nb - 1) * rb * cols  # static Python int
    # TODO(synk): on v7x (2 TensorCores) a leading size-2 "parallel" axis with
    # per-core partial sums would ~2x this calibration-only pass.
    return pl.pallas_call(
        functools.partial(_score_kernel, tail_valid=tail_valid,
                          needs_mask=needs_mask),
        out_shape=jax.ShapeDtypeStruct((3,), jnp.float32),
        grid=(nb,),
        in_specs=[
            pl.BlockSpec(memory_space=pltpu.MemorySpace.SMEM),
            pl.BlockSpec((rb, cols), lambda i: (i, 0)),
        ],
        out_specs=pl.BlockSpec(memory_space=pltpu.MemorySpace.SMEM),
        scratch_shapes=[pltpu.VMEM((3, 1, cols), jnp.float32)],
        compiler_params=pltpu.CompilerParams(
            dimension_semantics=("arbitrary",),
            vmem_limit_bytes=_VMEM_LIMIT_BYTES),
    )(params, x2d)


# ---------------------------------------------------------------------------
# Kernel 2: elementwise quantize -> clamp -> dequantize (forward hot path)
# ---------------------------------------------------------------------------
def _qdq_kernel(params_ref, x_ref, o_ref):
    delta = params_ref[0]
    inv_delta = params_ref[1]
    lo = params_ref[2]       # -zero_point
    hi = params_ref[3]       # (n_levels - 1) - zero_point
    x = x_ref[...].astype(jnp.float32)
    x_q = jnp.clip(jnp.round(x * inv_delta), lo, hi)
    o_ref[...] = (x_q * delta).astype(o_ref.dtype)


def _qdq_apply(x2d, params, rb):
    rows, cols = x2d.shape
    return pl.pallas_call(
        _qdq_kernel,
        out_shape=jax.ShapeDtypeStruct((rows, cols), x2d.dtype),
        grid=(pl.cdiv(rows, rb),),
        in_specs=[
            pl.BlockSpec(memory_space=pltpu.MemorySpace.SMEM),
            pl.BlockSpec((rb, cols), lambda i: (i, 0)),
        ],
        out_specs=pl.BlockSpec((rb, cols), lambda i: (i, 0)),
        compiler_params=pltpu.CompilerParams(
            dimension_semantics=("parallel",),
            vmem_limit_bytes=_VMEM_LIMIT_BYTES),
    )(params, x2d)


# ---------------------------------------------------------------------------
# Module-equivalent wrapper
# ---------------------------------------------------------------------------
class UniformQuantizer:
    """JAX/Pallas port of basicsr.models.RepQ_model.UniformQuantizer."""

    def __init__(self, n_bits: int = 8, channel_wise: bool = False):
        assert 2 <= n_bits <= 8, "bitwidth not supported"
        # TODO(synk): channel_wise=True calibration (per-channel python loop in
        # the reference) is not implemented; module default is False.
        assert not channel_wise
        self.n_bits = n_bits
        self.n_levels = 2 ** n_bits
        self.delta = None
        self.zero_point = None
        self.inited = False
        self.channel_wise = channel_wise

    # init_quantization_scale (channel_wise=False branch)
    def _init_quantization_scale(self, x):
        x_flat = x.reshape(-1)
        n = x_flat.shape[0]
        cols, rows, pad, rb = _layout(n, jnp.dtype(x.dtype).itemsize)
        x2d = _to_2d(x_flat, cols, rows, pad)

        pcts = (0.999, 0.9999, 0.99999)
        new_max, new_min = _tail_quantiles(x_flat, pcts)

        qmax = float(self.n_levels - 1)
        # Tiny eps guards the degenerate constant-tensor case (delta == 0).
        rng = jnp.maximum(new_max - new_min, jnp.float32(1e-8))
        deltas = rng / qmax
        zps = jnp.round(-new_min / deltas)
        # per-candidate [delta, 1/delta, lo=-zp, hi=qmax-zp]  -> (3, 4) f32
        params = jnp.stack([deltas, 1.0 / deltas, -zps, qmax - zps], axis=-1)

        # One fused pass over x scoring all 3 candidates (lp_loss p=2; the
        # common 1/n factor does not change the argmin).
        scores = _score_sums(x2d, params, n, rb)
        best = jnp.argmin(scores)  # first occurrence == strict '<' update
        return deltas[best], zps[best]

    def __call__(self, x):
        if not self.inited:
            self.delta, self.zero_point = self._init_quantization_scale(x)
            self.inited = True

        orig_shape = x.shape
        x_flat = x.reshape(-1)
        n = x_flat.shape[0]
        cols, rows, pad, rb = _layout(n, jnp.dtype(x.dtype).itemsize)
        x2d = _to_2d(x_flat, cols, rows, pad)

        delta = jnp.asarray(self.delta, jnp.float32)
        zp = jnp.asarray(self.zero_point, jnp.float32)
        qmax = jnp.float32(self.n_levels - 1)
        params = jnp.stack([delta, 1.0 / delta, -zp, qmax - zp])  # (4,) f32 SMEM

        y2d = _qdq_apply(x2d, params, rb)
        y = y2d.reshape(-1)
        if pad:
            y = y[:n]
        return y.reshape(orig_shape)


if __name__ == "__main__":
    key = jax.random.PRNGKey(0)
    x = jax.random.normal(key, (2, 4, 16, 16), dtype=jnp.float32)  # NCHW

    quantizer = UniformQuantizer(n_bits=8, channel_wise=False)
    y = jax.block_until_ready(quantizer(x))

    # --- reference calibration (plain JAX mirror of the torch code) ---
    xf = x.reshape(-1).astype(jnp.float32)
    qmax = float(quantizer.n_levels - 1)
    best_score, ref_delta, ref_zp = None, None, None
    for pct in (0.999, 0.9999, 0.99999):
        new_max = jnp.quantile(xf, pct)
        new_min = jnp.quantile(xf, 1.0 - pct)
        d = (new_max - new_min) / qmax
        z = jnp.round(-new_min / d)
        xq = (jnp.clip(jnp.round(xf / d) + z, 0.0, qmax) - z) * d
        score = float(jnp.mean((xf - xq) ** 2))
        if best_score is None or score < best_score:
            best_score, ref_delta, ref_zp = score, d, z
    assert jnp.allclose(quantizer.delta, ref_delta, rtol=1e-4, atol=1e-6), \
        "calibrated delta mismatch vs reference"
    assert jnp.allclose(quantizer.zero_point, ref_zp, atol=1e-3), \
        "calibrated zero_point mismatch vs reference"

    # --- forward-pass check vs plain-JAX qdq with the calibrated (delta, zp) ---
    d = jnp.asarray(quantizer.delta, jnp.float32)
    z = jnp.asarray(quantizer.zero_point, jnp.float32)
    ref_y = (jnp.clip(jnp.round(x * (1.0 / d)), -z, qmax - z) * d).astype(x.dtype)
    assert y.shape == x.shape and y.dtype == x.dtype
    assert jnp.allclose(y, ref_y, atol=1e-6), "forward qdq mismatch vs reference"

    # steady-state (already-inited) path
    y2 = jax.block_until_ready(quantizer(x))
    assert jnp.allclose(y2, y, atol=0.0), "inited-path mismatch"

    print("KERNEL_OK")
</pallas_src>

<mosaic_0001>
module attributes {stable_mosaic.version = 11 : i64} {
  func.func @_score_kernel(%arg0: i32, %arg1: memref<3x4xf32, #tpu.memory_space<smem>>, %arg2: memref<2x1024xf32, #tpu.memory_space<vmem>>, %arg3: memref<3xf32, #tpu.memory_space<smem>>, %arg4: memref<3x1x1024xf32, #tpu.memory_space<vmem>>) attributes {dimension_semantics = [#tpu.dimension_semantics<arbitrary>], iteration_bounds = array<i64: 1>, scalar_prefetch = 0 : i64, scratch_operands = 1 : i64, tpu.core_type = #tpu.core_type<tc>, window_params = [{transform_indices = @transform_0, window_bounds = array<i64: 3, 4>}, {transform_indices = @transform_1, window_bounds = array<i64: 2, 1024>}, {transform_indices = @transform_2, window_bounds = array<i64: 3>}]} {
    %c0_i32 = arith.constant 0 : i32
    %0 = arith.cmpi eq, %arg0, %c0_i32 : i32
    %1 = arith.extui %0 : i1 to i32
    %c0_i32_0 = arith.constant 0 : i32
    %2 = arith.cmpi ne, %1, %c0_i32_0 : i32
    scf.if %2 {
      %cst_45 = arith.constant 0.000000e+00 : f32
      %76 = vector.broadcast %cst_45 : f32 to vector<3x1x1024xf32>
      %c0_46 = arith.constant 0 : index
      %c0_47 = arith.constant 0 : index
      %c0_48 = arith.constant 0 : index
      %77 = vector.load %arg4[%c0_46, %c0_47, %c0_48] : memref<3x1x1024xf32, #tpu.memory_space<vmem>>, vector<3x1x1024xf32>
      tpu.vector_store %arg4[%c0_46, %c0_47, %c0_48], %76 {strides = array<i32>} : memref<3x1x1024xf32, #tpu.memory_space<vmem>>, vector<3x1x1024xf32>,
    } else {
    }
    %c0 = arith.constant 0 : index
    %c0_1 = arith.constant 0 : index
    %3 = vector.load %arg2[%c0, %c0_1] : memref<2x1024xf32, #tpu.memory_space<vmem>>, vector<2x1024xf32>
    %c0_2 = arith.constant 0 : index
    %c0_3 = arith.constant 0 : index
    %4 = memref.load %arg1[%c0_2, %c0_3] : memref<3x4xf32, #tpu.memory_space<smem>>
    %c0_4 = arith.constant 0 : index
    %c1 = arith.constant 1 : index
    %5 = memref.load %arg1[%c0_4, %c1] : memref<3x4xf32, #tpu.memory_space<smem>>
    %c0_5 = arith.constant 0 : index
    %c2 = arith.constant 2 : index
    %6 = memref.load %arg1[%c0_5, %c2] : memref<3x4xf32, #tpu.memory_space<smem>>
    %c0_6 = arith.constant 0 : index
    %c3 = arith.constant 3 : index
    %7 = memref.load %arg1[%c0_6, %c3] : memref<3x4xf32, #tpu.memory_space<smem>>
    %8 = vector.broadcast %5 : f32 to vector<2x1024xf32>
    %9 = arith.mulf %3, %8 : vector<2x1024xf32>
    %10 = math.roundeven %9 : vector<2x1024xf32>
    %11 = vector.broadcast %6 : f32 to vector<2x1024xf32>
    %12 = arith.maximumf %11, %10 : vector<2x1024xf32>
    %13 = vector.broadcast %7 : f32 to vector<2x1024xf32>
    %14 = arith.minimumf %13, %12 : vector<2x1024xf32>
    %15 = vector.broadcast %4 : f32 to vector<2x1024xf32>
    %16 = arith.mulf %14, %15 : vector<2x1024xf32>
    %17 = arith.subf %3, %16 : vector<2x1024xf32>
    %18 = arith.mulf %17, %17 : vector<2x1024xf32>
    %c0_7 = arith.constant 0 : index
    %c0_8 = arith.constant 0 : index
    %c0_9 = arith.constant 0 : index
    %19 = vector.load %arg4[%c0_7, %c0_8, %c0_9] : memref<3x1x1024xf32, #tpu.memory_space<vmem>>, vector<1x1x1024xf32>
    %20 = vector.shape_cast %19 : vector<1x1x1024xf32> to vector<1x1024xf32>
    %cst = arith.constant dense<0.000000e+00> : vector<1024xf32>
    %21 = vector.multi_reduction <add>, %18, %cst [0] : vector<2x1024xf32> to vector<1024xf32>
    %22 = vector.shape_cast %21 : vector<1024xf32> to vector<1x1024xf32>
    %23 = arith.addf %20, %22 : vector<1x1024xf32>
    %c0_10 = arith.constant 0 : index
    %c0_11 = arith.constant 0 : index
    %c0_12 = arith.constant 0 : index
    %24 = vector.load %arg4[%c0_10, %c0_11, %c0_12] : memref<3x1x1024xf32, #tpu.memory_space<vmem>>, vector<1x1x1024xf32>
    %25 = vector.shape_cast %24 : vector<1x1x1024xf32> to vector<1x1024xf32>
    %26 = vector.shape_cast %23 : vector<1x1024xf32> to vector<1x1x1024xf32>
    tpu.vector_store %arg4[%c0_10, %c0_11, %c0_12], %26 {strides = array<i32>} : memref<3x1x1024xf32, #tpu.memory_space<vmem>>, vector<1x1x1024xf32>,
    %c1_13 = arith.constant 1 : index
    %c0_14 = arith.constant 0 : index
    %27 = memref.load %arg1[%c1_13, %c0_14] : memref<3x4xf32, #tpu.memory_space<smem>>
    %c1_15 = arith.constant 1 : index
    %c1_16 = arith.constant 1 : index
    %28 = memref.load %arg1[%c1_15, %c1_16] : memref<3x4xf32, #tpu.memory_space<smem>>
    %c1_17 = arith.constant 1 : index
    %c2_18 = arith.constant 2 : index
    %29 = memref.load %arg1[%c1_17, %c2_18] : memref<3x4xf32, #tpu.memory_space<smem>>
    %c1_19 = arith.constant 1 : index
    %c3_20 = arith.constant 3 : index
    %30 = memref.load %arg1[%c1_19, %c3_20] : memref<3x4xf32, #tpu.memory_space<smem>>
    %31 = vector.broadcast %28 : f32 to vector<2x1024xf32>
    %32 = arith.mulf %3, %31 : vector<2x1024xf32>
    %33 = math.roundeven %32 : vector<2x1024xf32>
    %34 = vector.broadcast %29 : f32 to vector<2x1024xf32>
    %35 = arith.maximumf %34, %33 : vector<2x1024xf32>
    %36 = vector.broadcast %30 : f32 to vector<2x1024xf32>
    %37 = arith.minimumf %36, %35 : vector<2x1024xf32>
    %38 = vector.broadcast %27 : f32 to vector<2x1024xf32>
    %39 = arith.mulf %37, %38 : vector<2x1024xf32>
    %40 = arith.subf %3, %39 : vector<2x1024xf32>
    %41 = arith.mulf %40, %40 : vector<2x1024xf32>
    %c1_21 = arith.constant 1 : index
    %c0_22 = arith.constant 0 : index
    %c0_23 = arith.constant 0 : index
    %42 = vector.load %arg4[%c1_21, %c0_22, %c0_23] : memref<3x1x1024xf32, #tpu.memory_space<vmem>>, vector<1x1x1024xf32>
    %43 = vector.shape_cast %42 : vector<1x1x1024xf32> to vector<1x1024xf32>
    %cst_24 = arith.constant dense<0.000000e+00> : vector<1024xf32>
    %44 = vector.multi_reduction <add>, %41, %cst_24 [0] : vector<2x1024xf32> to vector<1024xf32>
    %45 = vector.shape_cast %44 : vector<1024xf32> to vector<1x1024xf32>
    %46 = arith.addf %43, %45 : vector<1x1024xf32>
    %c1_25 = arith.constant 1 : index
    %c0_26 = arith.constant 0 : index
    %c0_27 = arith.constant 0 : index
    %47 = vector.load %arg4[%c1_25, %c0_26, %c0_27] : memref<3x1x1024xf32, #tpu.memory_space<vmem>>, vector<1x1x1024xf32>
    %48 = vector.shape_cast %47 : vector<1x1x1024xf32> to vector<1x1024xf32>
    %49 = vector.shape_cast %46 : vector<1x1024xf32> to vector<1x1x1024xf32>
    tpu.vector_store %arg4[%c1_25, %c0_26, %c0_27], %49 {strides = array<i32>} : memref<3x1x1024xf32, #tpu.memory_space<vmem>>, vector<1x1x1024xf32>,
    %c2_28 = arith.constant 2 : index
    %c0_29 = arith.constant 0 : index
    %50 = memref.load %arg1[%c2_28, %c0_29] : memref<3x4xf32, #tpu.memory_space<smem>>
    %c2_30 = arith.constant 2 : index
    %c1_31 = arith.constant 1 : index
    %51 = memref.load %arg1[%c2_30, %c1_31] : memref<3x4xf32, #tpu.memory_space<smem>>
    %c2_32 = arith.constant 2 : index
    %c2_33 = arith.constant 2 : index
    %52 = memref.load %arg1[%c2_32, %c2_33] : memref<3x4xf32, #tpu.memory_space<smem>>
    %c2_34 = arith.constant 2 : index
    %c3_35 = arith.constant 3 : index
    %53 = memref.load %arg1[%c2_34, %c3_35] : memref<3x4xf32, #tpu.memory_space<smem>>
    %54 = vector.broadcast %51 : f32 to vector<2x1024xf32>
    %55 = arith.mulf %3, %54 : vector<2x1024xf32>
    %56 = math.roundeven %55 : vector<2x1024xf32>
    %57 = vector.broadcast %52 : f32 to vector<2x1024xf32>
    %58 = arith.maximumf %57, %56 : vector<2x1024xf32>
    %59 = vector.broadcast %53 : f32 to vector<2x1024xf32>
    %60 = arith.minimumf %59, %58 : vector<2x1024xf32>
    %61 = vector.broadcast %50 : f32 to vector<2x1024xf32>
    %62 = arith.mulf %60, %61 : vector<2x1024xf32>
    %63 = arith.subf %3, %62 : vector<2x1024xf32>
    %64 = arith.mulf %63, %63 : vector<2x1024xf32>
    %c2_36 = arith.constant 2 : index
    %c0_37 = arith.constant 0 : index
    %c0_38 = arith.constant 0 : index
    %65 = vector.load %arg4[%c2_36, %c0_37, %c0_38] : memref<3x1x1024xf32, #tpu.memory_space<vmem>>, vector<1x1x1024xf32>
    %66 = vector.shape_cast %65 : vector<1x1x1024xf32> to vector<1x1024xf32>
    %cst_39 = arith.constant dense<0.000000e+00> : vector<1024xf32>
    %67 = vector.multi_reduction <add>, %64, %cst_39 [0] : vector<2x1024xf32> to vector<1024xf32>
    %68 = vector.shape_cast %67 : vector<1024xf32> to vector<1x1024xf32>
    %69 = arith.addf %66, %68 : vector<1x1024xf32>
    %c2_40 = arith.constant 2 : index
    %c0_41 = arith.constant 0 : index
    %c0_42 = arith.constant 0 : index
    %70 = vector.load %arg4[%c2_40, %c0_41, %c0_42] : memref<3x1x1024xf32, #tpu.memory_space<vmem>>, vector<1x1x1024xf32>
    %71 = vector.shape_cast %70 : vector<1x1x1024xf32> to vector<1x1024xf32>
    %72 = vector.shape_cast %69 : vector<1x1024xf32> to vector<1x1x1024xf32>
    tpu.vector_store %arg4[%c2_40, %c0_41, %c0_42], %72 {strides = array<i32>} : memref<3x1x1024xf32, #tpu.memory_space<vmem>>, vector<1x1x1024xf32>,
    %c0_i32_43 = arith.constant 0 : i32
    %73 = arith.cmpi eq, %arg0, %c0_i32_43 : i32
    %74 = arith.extui %73 : i1 to i32
    %c0_i32_44 = arith.constant 0 : i32
    %75 = arith.cmpi ne, %74, %c0_i32_44 : i32
    scf.if %75 {
      %c0_45 = arith.constant 0 : index
      %c0_46 = arith.constant 0 : index
      %c0_47 = arith.constant 0 : index
      %76 = vector.load %arg4[%c0_45, %c0_46, %c0_47] : memref<3x1x1024xf32, #tpu.memory_space<vmem>>, vector<1x1x1024xf32>
      %77 = vector.shape_cast %76 : vector<1x1x1024xf32> to vector<1x1024xf32>
      %78 = vector.shape_cast %77 : vector<1x1024xf32> to vector<1x1x1024xf32>
      %cst_48 = arith.constant dense<0.000000e+00> : vector<1xf32>
      %79 = vector.multi_reduction <add>, %78, %cst_48 [1, 2] : vector<1x1x1024xf32> to vector<1xf32>
      %80 = vector.shape_cast %79 : vector<1xf32> to vector<1x1x1xf32>
      %81 = vector.extract %80[0, 0, 0] : f32 from vector<1x1x1xf32>
      %c0_49 = arith.constant 0 : index
      %82 = memref.load %arg3[%c0_49] : memref<3xf32, #tpu.memory_space<smem>>
      memref.store %81, %arg3[%c0_49] : memref<3xf32, #tpu.memory_space<smem>>
      %c1_50 = arith.constant 1 : index
      %c0_51 = arith.constant 0 : index
      %c0_52 = arith.constant 0 : index
      %83 = vector.load %arg4[%c1_50, %c0_51, %c0_52] : memref<3x1x1024xf32, #tpu.memory_space<vmem>>, vector<1x1x1024xf32>
      %84 = vector.shape_cast %83 : vector<1x1x1024xf32> to vector<1x1024xf32>
      %85 = vector.shape_cast %84 : vector<1x1024xf32> to vector<1x1x1024xf32>
      %cst_53 = arith.constant dense<0.000000e+00> : vector<1xf32>
      %86 = vector.multi_reduction <add>, %85, %cst_53 [1, 2] : vector<1x1x1024xf32> to vector<1xf32>
      %87 = vector.shape_cast %86 : vector<1xf32> to vector<1x1x1xf32>
      %88 = vector.extract %87[0, 0, 0] : f32 from vector<1x1x1xf32>
      %c1_54 = arith.constant 1 : index
      %89 = memref.load %arg3[%c1_54] : memref<3xf32, #tpu.memory_space<smem>>
      memref.store %88, %arg3[%c1_54] : memref<3xf32, #tpu.memory_space<smem>>
      %c2_55 = arith.constant 2 : index
      %c0_56 = arith.constant 0 : index
      %c0_57 = arith.constant 0 : index
      %90 = vector.load %arg4[%c2_55, %c0_56, %c0_57] : memref<3x1x1024xf32, #tpu.memory_space<vmem>>, vector<1x1x1024xf32>
      %91 = vector.shape_cast %90 : vector<1x1x1024xf32> to vector<1x1024xf32>
      %92 = vector.shape_cast %91 : vector<1x1024xf32> to vector<1x1x1024xf32>
      %cst_58 = arith.constant dense<0.000000e+00> : vector<1xf32>
      %93 = vector.multi_reduction <add>, %92, %cst_58 [1, 2] : vector<1x1x1024xf32> to vector<1xf32>
      %94 = vector.shape_cast %93 : vector<1xf32> to vector<1x1x1xf32>
      %95 = vector.extract %94[0, 0, 0] : f32 from vector<1x1x1xf32>
      %c2_59 = arith.constant 2 : index
      %96 = memref.load %arg3[%c2_59] : memref<3xf32, #tpu.memory_space<smem>>
      memref.store %95, %arg3[%c2_59] : memref<3xf32, #tpu.memory_space<smem>>
    } else {
    }
    return
  }
  func.func @transform_0(%arg0: i32) -> (i32, i32) {
    %c0_i32 = arith.constant 0 : i32
    %c0_i32_0 = arith.constant 0 : i32
    %c0_i32_1 = arith.constant 0 : i32
    return %c0_i32, %c0_i32_0 : i32, i32
  }
  func.func @transform_1(%arg0: i32) -> (i32, i32) {
    %c0_i32 = arith.constant 0 : i32
    %c0_i32_0 = arith.constant 0 : i32
    return %arg0, %c0_i32 : i32, i32
  }
  func.func @transform_2(%arg0: i32) -> i32 {
    %c0_i32 = arith.constant 0 : i32
    %c0_i32_0 = arith.constant 0 : i32
    return %c0_i32 : i32
  }
}

</mosaic_0001>

<bundles_post_ra>
// kernel: tpu_custom_call.1
= control target key start
LH: loop header
LB: loop body
LE: loop exit
PB: predicated region body
PF: predicated region fallthrough
CT: control target
= control target key end

     0   :  { %7 = vsyncpa [#allocation5], 0  ;;  %s1155_s0 = inlined_call_operand.hbm [shape: f32[3,4], index: 0, kind: input, shape index: {}]   ;;  %s1156_s1 = inlined_call_operand.hbm [shape: f32[2,1024], index: 1, kind: input, shape index: {}]   ;;  %s1157_s2 = inlined_call_operand.hbm [shape: f32[3], index: 2, kind: output, shape index: {}]  }
   0x1   :  { %8 = vsyncpa [#allocation4], 0 }
   0x2   :  { %9 = vsyncpa [#allocation6], 0  ;;  %s847_s11 = scalar_lea.hbm %s1155_s0, 64 }
   0x3   :  { %p848_p0 = scmp.ne.s32.totalorder %s1155_s0, %s847_s11  ;;  %p851_p1 = scmp.lt.u32.totalorder %s847_s11, %s1155_s0 }
   0x5   :  { %p853_p2 = pnand %p851_p1, %p848_p0 }
   0x7   :  { %856 = shalt.err (!%p853_p2)
}
   0x8   :  { %s895_s16 = smov [#allocation3]   ;;  %s896_s19 = smov [#allocation7]  }
   0x9   :  { %17 = dma.hbm_to_smem %s1155_s0, 64, %s895_s16, [#allocation5]  }
   0xa   :  { %s24_s20 = sshll.u32 %s896_s19, 4  ;;  %s857_s23 = scalar_lea.hbm %s1156_s1, 256  ;;  %s25_s20 = int_to_ptr.vmem [resolvable:$true] %s24_s20 }
   0xb   :  { %p858_p3 = scmp.ne.s32.totalorder %s1156_s1, %s857_s23  ;;  %p861_p4 = scmp.lt.u32.totalorder %s857_s23, %s1156_s1 }
   0xd   :  { %p863_p5 = pnand %p861_p4, %p858_p3 }
   0xf   :  { %866 = shalt.err (!%p863_p5)
}
  0x10   :  { %s867_s28 = scalar_lea.vmem %s25_s20, 256  ;;  %p872_p7 = scmp.lt.s32.totalorder %s25_s20, %s25_s20 }
  0x11   :  { %p868_p6 = scmp.ne.s32.totalorder %s25_s20, %s867_s28  ;;  %p873_p8 = scmp.lt.s32.totalorder %s867_s28, %s867_s28 }
  0x13   :  { %p874_p9 = por %p873_p8, %p872_p7 }
  0x15   :  { %p875_p10 = pnand %p874_p9, %p868_p6 }
  0x17   :  { %878 = shalt.err (!%p875_p10)
}
  0x18   :  { %27 = dma.hbm_to_vmem [thread:$0]  %s1156_s1, 256, %s25_s20, [#allocation4]  }
  0x19   :  { %889 = dma.done.wait [#allocation5], 64  }
  0x1a   :  { %890 = vsyncadd [#allocation5], 4294967232 }
  0x1b   :  { %891 = dma.done.wait [#allocation4], 256  }
  0x1c   :  { %892 = vsyncadd [#allocation4], 4294967040 }
  0x1d   :  { %34 = sfence }
  0x1e   :  { %s827_s30 = sld [smem:[#allocation3 + $0x101]]  ;;  %s939_s3 = sld [smem:[#allocation3 + $0x102]]  ;;  %v73_v0 = vlaneseq  ;;  %v897_v1 = vmov 1983009808   ;;  %v945_v3 = vld [vmem:[#allocation7] sm:$0xff]  ;;  %v947_v4 = vld [vmem:[#allocation7 + $0x8] sm:$0xff] }
  0x1f   :  { %s941_s4 = sld [smem:[#allocation3 + $0x103]]  ;;  %s819_s5 = sld [smem:[#allocation3 + $0x1]]  ;;  %v71_v2 = vunpack.c.l.s4 %v897_v1  ;;  %v898_v5 = vmov 1966171168   ;;  %vm111_vm0 = vcmask 1041408   ;;  %vm641_vm1 = vcmask 1040384  }
  0x20   :  { %s943_s6 = sld [smem:[#allocation3 + $0x2]]  ;;  %v949_v6 = vunpack.c.l.s4 %v898_v5  ;;  %s951_s1 = sld [smem:[#allocation3 + $0x100]]  ;;  %v74_v7 = vshrl.u32 %v73_v0, 7 }
  0x21   :  { %s953_s7 = sld [smem:[#allocation3 + $0x3]]  ;;  %s955_s8 = sld [smem:[#allocation3 + $0x81]]  ;;  %v72_v9 = vunpack.c.0.s8 %v71_v2 }
  0x22   :  { %s957_s9 = sld [smem:[#allocation3]]  ;;  %s959_s10 = sld [smem:[#allocation3 + $0x82]]  ;;  %v182_v12 = vunpack.c.0.s8 %v949_v6  ;;  %v965_v14 = vsub.s32 0, %v74_v7  ;;  %v970_v21 = vsub.s32 1, %v74_v7  ;;  %v972_v22 = vsub.s32 2, %v74_v7 }
  0x23   :  { %s975_s11 = sld [smem:[#allocation3 + $0x83]]  ;;  %v977_v28 = vsub.s32 %v72_v9, %v74_v7  ;;  %s981_s12 = sld [smem:[#allocation3 + $0x80]]  ;;  %v988_v44 = vsub.s32 3, %v74_v7  ;;  %v990_v45 = vsub.s32 4, %v74_v7  ;;  %v994_v52 = vsub.s32 5, %v74_v7 }
  0x24   :  { %v416_v8 = vstv %s827_s30  ;;  %v421_v13 = vstv %s939_s3  ;;  %v999_v60 = vsub.s32 %v182_v12, %v74_v7  ;;  %v1001_v61 = vsub.s32 6, %v74_v7  ;;  %s879_s18 = scalar_lea.hbm %s1157_s2, 16 }
  0x25   :  { %v417_v10 = vmul.f32 %v416_v8, %v945_v3  ;;  %v418_v11 = vmul.f32 %v416_v8, %v947_v4  ;;  %v48_v15 = vstv %s819_s5  ;;  %v424_v20 = vstv %s941_s4  ;;  %p880_p11 = scmp.ne.s32.totalorder %s1157_s2, %s879_s18  ;;  %p883_p12 = scmp.lt.u32.totalorder %s879_s18, %s1157_s2 }
  0x26   :  { %v49_v18 = vmul.f32 %v48_v15, %v945_v3  ;;  %v50_v19 = vmul.f32 %v48_v15, %v947_v4  ;;  %v53_v23 = vstv %s943_s6  ;;  %v427_v29 = vstv %s951_s1 }
  0x27   :  { %v834_v16 = vround.rtne.f32 %v417_v10  ;;  %v835_v17 = vround.rtne.f32 %v418_v11  ;;  %v56_v30 = vstv %s953_s7  ;;  %v232_v31 = vstv %s955_s8  ;;  %p885_p13 = pnand %p883_p12, %p880_p11 }
  0x28   :  { %v830_v26 = vround.rtne.f32 %v49_v18  ;;  %v831_v27 = vround.rtne.f32 %v50_v19  ;;  %v59_v36 = vstv %s957_s9  ;;  %v233_v37 = vmul.f32 %v232_v31, %v945_v3 }
  0x29   :  { %v422_v24 = vmax.f32 %v421_v13, %v834_v16  ;;  %v423_v25 = vmax.f32 %v421_v13, %v835_v17  ;;  %v234_v38 = vmul.f32 %v232_v31, %v947_v4  ;;  %v237_v39 = vstv %s959_s10 }
  0x2a   :  { %v54_v34 = vmax.f32 %v53_v23, %v830_v26  ;;  %v55_v35 = vmax.f32 %v53_v23, %v831_v27  ;;  %v832_v46 = vround.rtne.f32 %v233_v37  ;;  %v240_v55 = vstv %s975_s11 }
  0x2b   :  { %v425_v32 = vmin.f32 %v424_v20, %v422_v24  ;;  %v426_v33 = vmin.f32 %v424_v20, %v423_v25  ;;  %v833_v47 = vround.rtne.f32 %v234_v38  ;;  %v1003_v62 = vsub.s32 7, %v74_v7 }
  0x2c   :  { %v57_v42 = vmin.f32 %v56_v30, %v54_v34  ;;  %v58_v43 = vmin.f32 %v56_v30, %v55_v35  ;;  %v238_v53 = vmax.f32 %v237_v39, %v832_v46  ;;  %v243_v63 = vstv %s981_s12 }
  0x2d   :  { %v428_v40 = vmul.f32 %v427_v29, %v425_v32  ;;  %v429_v41 = vmul.f32 %v427_v29, %v426_v33  ;;  %v239_v54 = vmax.f32 %v237_v39, %v833_v47 }
  0x2e   :  { %v60_v50 = vmul.f32 %v59_v36, %v57_v42  ;;  %v61_v51 = vmul.f32 %v59_v36, %v58_v43  ;;  %v1012_v9 = vmin.f32 %v240_v55, %v238_v53 }
  0x2f   :  { %v430_v48 = vsub.f32 %v945_v3, %v428_v40  ;;  %v431_v49 = vsub.f32 %v947_v4, %v429_v41  ;;  %v1014_v10 = vmin.f32 %v240_v55, %v239_v54 }
  0x30   :  { %v62_v58 = vsub.f32 %v945_v3, %v60_v50  ;;  %v63_v59 = vsub.f32 %v947_v4, %v61_v51 }
  0x31   :  { %v432_v56 = vmul.f32 %v430_v48, %v430_v48  ;;  %v433_v57 = vmul.f32 %v431_v49, %v431_v49 }
  0x32   :  { %v1008_v6 = vmul.f32 %v62_v58, %v62_v58  ;;  %v1010_v8 = vmul.f32 %v63_v59, %v63_v59 }
  0x33   :  { %v438_v0 = vcombine.high %v432_v56, %v432_v56  ;;  %v445_v1 = vrot.slane %v432_v56, %v977_v28  ;;  %v455_v2 = vcombine.high %v433_v57, %v433_v57  ;;  %v462_v5 = vrot.slane %v433_v57, %v977_v28 }
  0x34   :  { %v69_v17 = vcombine.high %v1008_v6, %v1008_v6  ;;  %v1024_v18 = vrot.slane %v1008_v6, %v977_v28 }
  0x35   :  { %v452_v11 = vrot.slane %v438_v0, %v977_v28  ;;  %v453_v12 = vcombine.high %v445_v1, %v445_v1  ;;  %v469_v7 = vrot.slane %v455_v2, %v977_v28  ;;  %v470_v13 = vcombine.high %v462_v5, %v462_v5 }
  0x36   :  { %v480_v15 = vsel %vm111_vm0, %v445_v1, 0.0  ;;  %v508_v16 = vsel %vm111_vm0, %v462_v5, 0.0 }
  0x37   :  { %v454_v19 = vcombine.high %v452_v11, %v452_v11  ;;  %v471_v20 = vcombine.high %v469_v7, %v469_v7  ;;  %v481_v23 = vrot.slane %v480_v15, 4  ;;  %v487_v24 = vsel %vm111_vm0, %v453_v12, 0.0 }
  0x38   :  { %v488_v25 = vrot.slane %v487_v24, 4  ;;  %v494_v26 = vsel %vm111_vm0, %v452_v11, 0.0  ;;  %v509_v27 = vrot.slane %v508_v16, 4  ;;  %v515_v29 = vsel %vm111_vm0, %v470_v13, 0.0 }
  0x39   :  { %v482_v30 = vadd.f32 %v481_v23, %v480_v15  ;;  %v495_v31 = vrot.slane %v494_v26, 4  ;;  %v501_v32 = vsel %vm111_vm0, %v454_v19, 0.0  ;;  %v516_v33 = vrot.slane %v515_v29, 4 }
  0x3a   :  { %v489_v34 = vadd.f32 %v488_v25, %v487_v24  ;;  %v502_v35 = vrot.slane %v501_v32, 4  ;;  %v510_v36 = vadd.f32 %v509_v27, %v508_v16  ;;  %v522_v37 = vsel %vm111_vm0, %v469_v7, 0.0 }
  0x3b   :  { %v483_v38 = vrot.slane %v482_v30, 2  ;;  %v496_v39 = vadd.f32 %v495_v31, %v494_v26  ;;  %v517_v40 = vadd.f32 %v516_v33, %v515_v29  ;;  %v523_v41 = vrot.slane %v522_v37, 4 }
  0x3c   :  { %v490_v42 = vrot.slane %v489_v34, 2  ;;  %v503_v43 = vadd.f32 %v502_v35, %v501_v32  ;;  %v511_v46 = vrot.slane %v510_v36, 2  ;;  %v529_v47 = vsel %vm111_vm0, %v471_v20, 0.0 }
  0x3d   :  { %v484_v48 = vadd.f32 %v483_v38, %v482_v30  ;;  %v497_v49 = vrot.slane %v496_v39, 2  ;;  %v518_v50 = vrot.slane %v517_v40, 2  ;;  %v524_v51 = vadd.f32 %v523_v41, %v522_v37 }
  0x3e   :  { %v491_v53 = vadd.f32 %v490_v42, %v489_v34  ;;  %v504_v54 = vrot.slane %v503_v43, 2  ;;  %v512_v55 = vadd.f32 %v511_v46, %v510_v36  ;;  %v530_v56 = vrot.slane %v529_v47, 4 }
  0x3f   :  { %v485_v57 = vrot.slane %v484_v48, 1  ;;  %v498_v58 = vadd.f32 %v497_v49, %v496_v39  ;;  %v519_v59 = vadd.f32 %v518_v50, %v517_v40  ;;  %v525_v0 = vrot.slane %v524_v51, 2 }
  0x40   :  { %v492_v1 = vrot.slane %v491_v53, 1  ;;  %v505_v2 = vadd.f32 %v504_v54, %v503_v43  ;;  %v513_v5 = vrot.slane %v512_v55, 1  ;;  %v531_v6 = vadd.f32 %v530_v56, %v529_v47 }
  0x41   :  { %v486_v11 = vadd.f32 %v485_v57, %v484_v48  ;;  %v499_v12 = vrot.slane %v498_v58, 1  ;;  %v520_v7 = vrot.slane %v519_v59, 1  ;;  %v526_v13 = vadd.f32 %v525_v0, %v524_v51 }
  0x42   :  { %v493_v15 = vadd.f32 %v492_v1, %v491_v53  ;;  %v506_v16 = vrot.slane %v505_v2, 1  ;;  %v514_v19 = vadd.f32 %v513_v5, %v512_v55  ;;  %v532_v20 = vrot.slane %v531_v6, 2 }
  0x43   :  { %v500_v23 = vadd.f32 %v499_v12, %v498_v58  ;;  %v521_v24 = vadd.f32 %v520_v7, %v519_v59  ;;  %v527_v25 = vrot.slane %v526_v13, 1  ;;  %v83_v26 = vrot.slane %v69_v17, %v977_v28 }
  0x44   :  { %v507_v27 = vadd.f32 %v506_v16, %v505_v2  ;;  %v533_v29 = vadd.f32 %v532_v20, %v531_v6  ;;  %v544_v30 = vcombine.low %v486_v11, %v493_v15  ;;  %v84_v31 = vcombine.high %v1024_v18, %v1024_v18 }
  0x45   :  { %v528_v32 = vadd.f32 %v527_v25, %v526_v13  ;;  %v546_v33 = vcombine.low %v514_v19, %v521_v24  ;;  %v85_v34 = vcombine.high %v83_v26, %v83_v26  ;;  %v86_v35 = vcombine.high %v1010_v8, %v1010_v8 }
  0x46   :  { %v534_v36 = vrot.slane %v533_v29, 1  ;;  %v545_v37 = vcombine.low %v500_v23, %v507_v27  ;;  %v554_v38 = vrot.slane %v544_v30, %v999_v60  ;;  %v93_v17 = vrot.slane %v1010_v8, %v977_v28 }
  0x47   :  { %v568_v39 = vrot.slane %v546_v33, %v999_v60  ;;  %v112_v40 = vsel %vm111_vm0, %v1024_v18, 0.0  ;;  %v119_v41 = vsel %vm111_vm0, %v84_v31, 0.0  ;;  %v1047_v42 = vmul.f32 %v243_v63, %v1012_v9 }
  0x48   :  { %v535_v43 = vadd.f32 %v534_v36, %v533_v29  ;;  %v561_v46 = vrot.slane %v545_v37, %v999_v60  ;;  %v101_v47 = vcombine.high %v93_v17, %v93_v17  ;;  %v113_v48 = vrot.slane %v112_v40, 4 }
  0x49   :  { %v1051_v49 = vrot.slane %v86_v35, %v977_v28  ;;  %v120_v8 = vrot.slane %v119_v41, 4  ;;  %v126_v50 = vsel %vm111_vm0, %v83_v26, 0.0  ;;  %v133_v51 = vsel %vm111_vm0, %v85_v34, 0.0 }
  0x4a   :  { %v547_v18 = vcombine.low %v528_v32, %v535_v43  ;;  %v576_v53 = vcombine.low %v554_v38, %v561_v46  ;;  %v114_v54 = vadd.f32 %v113_v48, %v112_v40  ;;  %v127_v55 = vrot.slane %v126_v50, 4 }
  0x4b   :  { %v121_v9 = vadd.f32 %v120_v8, %v119_v41  ;;  %v134_v56 = vrot.slane %v133_v51, 4  ;;  %v140_v57 = vsel %vm111_vm0, %v93_v17, 0.0  ;;  %v147_v58 = vsel %vm111_vm0, %v101_v47, 0.0 }
  0x4c   :  { %v575_v59 = vrot.slane %v547_v18, %v999_v60  ;;  %v584_v0 = vrot.slane %v576_v53, %v999_v60  ;;  %v115_v1 = vrot.slane %v114_v54, 2  ;;  %v128_v2 = vadd.f32 %v127_v55, %v126_v50 }
  0x4d   :  { %v122_v5 = vrot.slane %v121_v9, 2  ;;  %v135_v6 = vadd.f32 %v134_v56, %v133_v51  ;;  %v141_v11 = vrot.slane %v140_v57, 4  ;;  %v148_v12 = vrot.slane %v147_v58, 4 }
  0x4e   :  { %v577_v7 = vcombine.low %v568_v39, %v575_v59  ;;  %v116_v13 = vadd.f32 %v115_v1, %v114_v54  ;;  %v129_v15 = vrot.slane %v128_v2, 2  ;;  %v154_v16 = vsel %vm111_vm0, %v1051_v49, 0.0 }
  0x4f   :  { %v123_v19 = vadd.f32 %v122_v5, %v121_v9  ;;  %v136_v20 = vrot.slane %v135_v6, 2  ;;  %v142_v23 = vadd.f32 %v141_v11, %v140_v57  ;;  %v149_v24 = vadd.f32 %v148_v12, %v147_v58 }
  0x50   :  { %v591_v25 = vrot.slane %v577_v7, %v999_v60  ;;  %v117_v26 = vrot.slane %v116_v13, 1  ;;  %v130_v27 = vadd.f32 %v129_v15, %v128_v2  ;;  %v155_v29 = vrot.slane %v154_v16, 4 }
  0x51   :  { %v124_v30 = vrot.slane %v123_v19, 1  ;;  %v137_v31 = vadd.f32 %v136_v20, %v135_v6  ;;  %v143_v32 = vrot.slane %v142_v23, 2  ;;  %v150_v33 = vrot.slane %v149_v24, 2 }
  0x52   :  { %v592_v34 = vcombine.low %v584_v0, %v591_v25  ;;  %v102_v35 = vcombine.high %v1051_v49, %v1051_v49  ;;  %v118_v36 = vadd.f32 %v117_v26, %v116_v13  ;;  %v245_v37 = vmul.f32 %v243_v63, %v1014_v10 }
  0x53   :  { %v131_v38 = vrot.slane %v130_v27, 1  ;;  %v138_v17 = vrot.slane %v137_v31, 1  ;;  %v144_v39 = vadd.f32 %v143_v32, %v142_v23  ;;  %v156_v40 = vadd.f32 %v155_v29, %v154_v16 }
  0x54   :  { %v741_v41 = vrot.slane %v592_v34, %v965_v14  ;;  %v745_v43 = vrot.slane %v592_v34, %v970_v21  ;;  %v749_v46 = vrot.slane %v592_v34, %v972_v22  ;;  %v753_v47 = vrot.slane %v592_v34, %v988_v44 }
  0x55   :  { %v757_v48 = vrot.slane %v592_v34, %v990_v45  ;;  %v761_v49 = vrot.slane %v592_v34, %v994_v52  ;;  %v125_v8 = vadd.f32 %v124_v30, %v123_v19  ;;  %v151_v50 = vadd.f32 %v150_v33, %v149_v24 }
  0x56   :  { %v765_v63 = vrot.slane %v592_v34, %v1001_v61  ;;  %v778_v10 = vsel %vm641_vm1, %v741_v41, 0.0  ;;  %v779_v51 = vsel %vm641_vm1, %v745_v43, 0.0  ;;  %v781_v18 = vsel %vm641_vm1, %v749_v46, 0.0 }
  0x57   :  { %v769_v53 = vrot.slane %v592_v34, %v1003_v62  ;;  %v780_v54 = vadd.f32 %v779_v51, %v778_v10  ;;  %v783_v55 = vsel %vm641_vm1, %v753_v47, 0.0  ;;  %v785_v9 = vsel %vm641_vm1, %v757_v48, 0.0 }
  0x58   :  { %v787_v56 = vsel %vm641_vm1, %v761_v49, 0.0  ;;  %v132_v57 = vadd.f32 %v131_v38, %v130_v27  ;;  %v139_v58 = vadd.f32 %v138_v17, %v137_v31  ;;  %v145_v59 = vrot.slane %v144_v39, 1 }
  0x59   :  { %v782_v0 = vadd.f32 %v781_v18, %v780_v54  ;;  %v152_v1 = vrot.slane %v151_v50, 1  ;;  %v157_v2 = vrot.slane %v156_v40, 2  ;;  %v161_v5 = vsel %vm111_vm0, %v102_v35, 0.0 }
  0x5a   :  { %v146_v6 = vadd.f32 %v145_v59, %v144_v39  ;;  %v162_v11 = vrot.slane %v161_v5, 4  ;;  %v176_v12 = vcombine.low %v118_v36, %v125_v8  ;;  %v177_v7 = vcombine.low %v132_v57, %v139_v58 }
  0x5b   :  { %v784_v13 = vadd.f32 %v783_v55, %v782_v0  ;;  %v153_v15 = vadd.f32 %v152_v1, %v151_v50  ;;  %v158_v16 = vadd.f32 %v157_v2, %v156_v40  ;;  %v246_v19 = vsub.f32 %v945_v3, %v1047_v42 }
  0x5c   :  { %v163_v20 = vadd.f32 %v162_v11, %v161_v5  ;;  %v186_v23 = vrot.slane %v176_v12, %v999_v60  ;;  %v193_v24 = vrot.slane %v177_v7, %v999_v60  ;;  %v247_v25 = vsub.f32 %v947_v4, %v245_v37 }
  0x5d   :  { %v786_v26 = vadd.f32 %v785_v9, %v784_v13  ;;  %v159_v27 = vrot.slane %v158_v16, 1  ;;  %v178_v29 = vcombine.low %v146_v6, %v153_v15  ;;  %v248_v30 = vmul.f32 %v246_v19, %v246_v19 }
  0x5e   :  { %v789_v31 = vsel %vm641_vm1, %v765_v63, 0.0  ;;  %v164_v32 = vrot.slane %v163_v20, 2  ;;  %v208_v33 = vcombine.low %v186_v23, %v193_v24  ;;  %v249_v34 = vmul.f32 %v247_v25, %v247_v25 }
  0x5f   :  { %v788_v35 = vadd.f32 %v787_v56, %v786_v26  ;;  %v791_v36 = vsel %vm641_vm1, %v769_v53, 0.0  ;;  %v254_v3 = vcombine.high %v248_v30, %v248_v30  ;;  %v160_v42 = vadd.f32 %v159_v27, %v158_v16 }
  0x60   :  { %v165_v38 = vadd.f32 %v164_v32, %v163_v20  ;;  %v261_v17 = vrot.slane %v248_v30, %v977_v28  ;;  %v271_v39 = vcombine.high %v249_v34, %v249_v34  ;;  %v200_v4 = vrot.slane %v178_v29, %v999_v60 }
  0x61   :  { %v790_v40 = vadd.f32 %v789_v31, %v788_v35  ;;  %v268_v37 = vrot.slane %v254_v3, %v977_v28  ;;  %v278_v41 = vrot.slane %v249_v34, %v977_v28  ;;  %v216_v46 = vrot.slane %v208_v33, %v999_v60 }
  0x62   :  { %v166_v43 = vrot.slane %v165_v38, 1  ;;  %v269_v47 = vcombine.high %v261_v17, %v261_v17  ;;  %v296_v48 = vsel %vm111_vm0, %v261_v17, 0.0  ;;  %v285_v51 = vrot.slane %v271_v39, %v977_v28 }
  0x63   :  { %v792_v49 = vadd.f32 %v791_v36, %v790_v40  ;;  %v270_v8 = vcombine.high %v268_v37, %v268_v37  ;;  %v286_v50 = vcombine.high %v278_v41, %v278_v41  ;;  %v297_v63 = vrot.slane %v296_v48, 4 }
  0x64   :  { %v167_v10 = vadd.f32 %v166_v43, %v165_v38  ;;  %v303_v18 = vsel %vm111_vm0, %v269_v47, 0.0  ;;  %v310_v53 = vsel %vm111_vm0, %v268_v37, 0.0  ;;  %v324_v59 = vsel %vm111_vm0, %v278_v41, 0.0 }
  0x65   :  { %793 = vadd.xlane.f32.xlu1 %v792_v49  ;;  %v298_v54 = vadd.f32 %v297_v63, %v296_v48  ;;  %v304_v55 = vrot.slane %v303_v18, 4  ;;  %v311_v9 = vrot.slane %v310_v53, 4  ;;  %v317_v56 = vsel %vm111_vm0, %v270_v8, 0.0 }
  0x66   :  { %v179_v57 = vcombine.low %v160_v42, %v167_v10  ;;  %v318_v58 = vrot.slane %v317_v56, 4  ;;  %v331_v0 = vsel %vm111_vm0, %v286_v50, 0.0  ;;  %v325_v28 = vrot.slane %v324_v59, 4 }
  0x67   :  { %v299_v1 = vrot.slane %v298_v54, 2  ;;  %v305_v2 = vadd.f32 %v304_v55, %v303_v18  ;;  %v312_v5 = vadd.f32 %v311_v9, %v310_v53  ;;  %v332_v12 = vrot.slane %v331_v0, 4 }
  0x68   :  { %v207_v6 = vrot.slane %v179_v57, %v999_v60  ;;  %v319_v11 = vadd.f32 %v318_v58, %v317_v56  ;;  %v338_v7 = vsel %vm111_vm0, %v285_v51, 0.0  ;;  %v326_v19 = vadd.f32 %v325_v28, %v324_v59 }
  0x69   :  { %v300_v13 = vadd.f32 %v299_v1, %v298_v54  ;;  %v306_v15 = vrot.slane %v305_v2, 2  ;;  %v313_v16 = vrot.slane %v312_v5, 2  ;;  %v333_v24 = vadd.f32 %v332_v12, %v331_v0 }
  0x6a   :  { %v209_v20 = vcombine.low %v200_v4, %v207_v6  ;;  %v320_v23 = vrot.slane %v319_v11, 2  ;;  %v339_v25 = vrot.slane %v338_v7, 4  ;;  %v327_v29 = vrot.slane %v326_v19, 2 }
  0x6b   :  { %v307_v26 = vadd.f32 %v306_v15, %v305_v2  ;;  %v314_v27 = vadd.f32 %v313_v16, %v312_v5  ;;  %v334_v31 = vrot.slane %v333_v24, 2  ;;  %v287_v32 = vcombine.high %v285_v51, %v285_v51 }
  0x6c   :  { %v223_v30 = vrot.slane %v209_v20, %v999_v60  ;;  %v321_v33 = vadd.f32 %v320_v23, %v319_v11  ;;  %v340_v34 = vadd.f32 %v339_v25, %v338_v7  ;;  %v301_v36 = vrot.slane %v300_v13, 1 }
  0x6d   :  { %v308_v3 = vrot.slane %v307_v26, 1  ;;  %v315_v42 = vrot.slane %v314_v27, 1  ;;  %v328_v38 = vadd.f32 %v327_v29, %v326_v19  ;;  %v335_v17 = vadd.f32 %v334_v31, %v333_v24 }
  0x6e   :  { %v224_v35 = vcombine.low %v216_v46, %v223_v30  ;;  %v322_v41 = vrot.slane %v321_v33, 1  ;;  %v341_v43 = vrot.slane %v340_v34, 2  ;;  %v345_v47 = vsel %vm111_vm0, %v287_v32, 0.0 }
  0x6f   :  { %v302_v63 = vadd.f32 %v301_v36, %v300_v13  ;;  %v309_v10 = vadd.f32 %v308_v3, %v307_v26  ;;  %v316_v51 = vadd.f32 %v315_v42, %v314_v27  ;;  %v329_v54 = vrot.slane %v328_v38, 1 }
  0x70   :  { %v604_v39 = vrot.slane %v224_v35, %v965_v14  ;;  %v608_v40 = vrot.slane %v224_v35, %v970_v21  ;;  %v612_v4 = vrot.slane %v224_v35, %v972_v22  ;;  %v616_v37 = vrot.slane %v224_v35, %v988_v44 }
  0x71   :  { %v620_v48 = vrot.slane %v224_v35, %v990_v45  ;;  %v624_v18 = vrot.slane %v224_v35, %v994_v52  ;;  %v336_v55 = vrot.slane %v335_v17, 1  ;;  %v323_v56 = vadd.f32 %v322_v41, %v321_v33 }
  0x72   :  { %v642_v46 = vsel %vm641_vm1, %v604_v39, 0.0  ;;  %v643_v49 = vsel %vm641_vm1, %v608_v40, 0.0  ;;  %v645_v8 = vsel %vm641_vm1, %v612_v4, 0.0  ;;  %v647_v53 = vsel %vm641_vm1, %v616_v37, 0.0 }
  0x73   :  { %v644_v50 = vadd.f32 %v643_v49, %v642_v46  ;;  %v342_v57 = vadd.f32 %v341_v43, %v340_v34  ;;  %v346_v58 = vrot.slane %v345_v47, 4  ;;  %v628_v59 = vrot.slane %v224_v35, %v1001_v61 }
  0x74   :  { %v649_v0 = vsel %vm641_vm1, %v620_v48, 0.0  ;;  %v632_v1 = vrot.slane %v224_v35, %v1003_v62  ;;  %v651_v28 = vsel %vm641_vm1, %v624_v18, 0.0  ;;  %v330_v6 = vadd.f32 %v329_v54, %v328_v38 }
  0x75   :  { %v646_v9 = vadd.f32 %v645_v8, %v644_v50  ;;  %v347_v5 = vadd.f32 %v346_v58, %v345_v47  ;;  %v337_v11 = vadd.f32 %v336_v55, %v335_v17  ;;  %v360_v12 = vcombine.low %v302_v63, %v309_v10 }
  0x76   :  { %v343_v13 = vrot.slane %v342_v57, 1  ;;  %v361_v16 = vcombine.low %v316_v51, %v323_v56  ;;  %v653_v19 = vsel %vm641_vm1, %v628_v59, 0.0  ;;  %v655_v24 = vsel %vm641_vm1, %v632_v1, 0.0 }
  0x77   :  { %v648_v2 = vadd.f32 %v647_v53, %v646_v9  ;;  %v348_v15 = vrot.slane %v347_v5, 2  ;;  %v362_v25 = vcombine.low %v330_v6, %v337_v11  ;;  %v370_v26 = vrot.slane %v360_v12, %v999_v60 }
  0x78   :  { %v344_v29 = vadd.f32 %v343_v13, %v342_v57  ;;  %v377_v31 = vrot.slane %v361_v16, %v999_v60 }
  0x79   :  { %v650_v7 = vadd.f32 %v649_v0, %v648_v2  ;;  %v349_v23 = vadd.f32 %v348_v15, %v347_v5  ;;  %v384_v35 = vrot.slane %v362_v25, %v999_v60 }
  0x7a   :  { %v392_v36 = vcombine.low %v370_v26, %v377_v31 }
  0x7b   :  { %v652_v20 = vadd.f32 %v651_v28, %v650_v7  ;;  %v350_v30 = vrot.slane %v349_v23, 1 }
  0x7c   :  { %v400_v38 = vrot.slane %v392_v36, %v999_v60 }
  0x7d   :  { %v654_v27 = vadd.f32 %v653_v19, %v652_v20  ;;  %v351_v33 = vadd.f32 %v350_v30, %v349_v23 }
  0x7f   :  { %v656_v32 = vadd.f32 %v655_v24, %v654_v27  ;;  %v363_v34 = vcombine.low %v344_v29, %v351_v33 }
  0x81   :  { %657 = vadd.xlane.f32.xlu0 %v656_v32  ;;  %v391_v3 = vrot.slane %v363_v34, %v999_v60 }
  0x83   :  { %v393_v42 = vcombine.low %v384_v35, %v391_v3 }
  0x85   :  { %v407_v17 = vrot.slane %v393_v42, %v999_v60 }
  0x87   :  { %v408_v39 = vcombine.low %v400_v38, %v407_v17 }
  0x89   :  { %v673_v40 = vrot.slane %v408_v39, %v965_v14  ;;  %v677_v4 = vrot.slane %v408_v39, %v970_v21  ;;  %v681_v37 = vrot.slane %v408_v39, %v972_v22  ;;  %v685_v41 = vrot.slane %v408_v39, %v988_v44 }
  0x8a   :  { %v697_v43 = vrot.slane %v408_v39, %v1001_v61  ;;  %v701_v47 = vrot.slane %v408_v39, %v1003_v62  ;;  %v689_v48 = vrot.slane %v408_v39, %v990_v45  ;;  %v693_v21 = vrot.slane %v408_v39, %v994_v52 }
  0x8b   :  { %v710_v46 = vsel %vm641_vm1, %v673_v40, 0.0  ;;  %v711_v49 = vsel %vm641_vm1, %v677_v4, 0.0  ;;  %v713_v60 = vsel %vm641_vm1, %v681_v37, 0.0  ;;  %v715_v22 = vsel %vm641_vm1, %v685_v41, 0.0 }
  0x8c   :  { %v712_v8 = vadd.f32 %v711_v49, %v710_v46  ;;  %v721_v14 = vsel %vm641_vm1, %v697_v43, 0.0  ;;  %v723_v44 = vsel %vm641_vm1, %v701_v47, 0.0  ;;  %v717_v62 = vsel %vm641_vm1, %v689_v48, 0.0 }
  0x8d   :  { %v719_v45 = vsel %vm641_vm1, %v693_v21, 0.0 }
  0x8e   :  { %v714_v61 = vadd.f32 %v713_v60, %v712_v8 }
  0x90   :  { %v716_v50 = vadd.f32 %v715_v22, %v714_v61 }
  0x92   :  { %v718_v63 = vadd.f32 %v717_v62, %v716_v50 }
  0x94   :  { %v720_v10 = vadd.f32 %v719_v45, %v718_v63 }
  0x96   :  { %v722_v51 = vadd.f32 %v721_v14, %v720_v10 }
  0x98   :  { %v724_v18 = vadd.f32 %v723_v44, %v722_v51 }
  0x9a   :  { %725 = vadd.xlane.f32.xlu0 %v724_v18 }
  0xf2   :  { %v794_v58 = vpop.xlane.xlu1 %793 }
  0xf3   :  { %v795_v59 = vrot.slane %v794_v58, 4 }
  0xf5   :  { %v796_v0 = vadd.f32 %v795_v59, %v794_v58 }
  0xf7   :  { %v797_v1 = vrot.slane %v796_v0, 2 }
  0xf9   :  { %v798_v6 = vadd.f32 %v797_v1, %v796_v0 }
  0xfb   :  { %v799_v7 = vrot.slane %v798_v6, 1 }
  0xfd   :  { %v800_v16 = vadd.f32 %v799_v7, %v798_v6 }
 0x10e   :  { %v658_v53 = vpop.xlane.xlu0 %657 }
 0x10f   :  { %v659_v54 = vrot.slane %v658_v53, 4 }
 0x111   :  { %v660_v55 = vadd.f32 %v659_v54, %v658_v53 }
 0x113   :  { %v661_v9 = vrot.slane %v660_v55, 2 }
 0x115   :  { %v662_v52 = vadd.f32 %v661_v9, %v660_v55 }
 0x117   :  { %v663_v56 = vrot.slane %v662_v52, 1 }
 0x119   :  { %v664_v57 = vadd.f32 %v663_v56, %v662_v52 }
 0x11b   :  { %836 = vpush %v664_v57 }
 0x127   :  { %v726_v2 = vpop.xlane.xlu0 %725 }
 0x128   :  { %v727_v5 = vrot.slane %v726_v2, 4 }
 0x12a   :  { %v728_v28 = vadd.f32 %v727_v5, %v726_v2 }
 0x12c   :  { %v729_v11 = vrot.slane %v728_v28, 2 }
 0x12e   :  { %v730_v12 = vadd.f32 %v729_v11, %v728_v28 }
 0x130   :  { %v731_v13 = vrot.slane %v730_v12, 1 }
 0x132   :  { %v732_v15 = vadd.f32 %v731_v13, %v730_v12 }
 0x134   :  { %838 = vpush %v732_v15 }
 0x135   :  { %840 = vpush %v800_v16 }
 0x14c   :  { %s837_s13 = spop %836 }
 0x14d   :  { %667 = sst [smem:[#allocation8]] %s837_s13 }
 0x165   :  { %s839_s14 = spop %838 }
 0x166   :  { %735 = sst [smem:[#allocation8 + $0x1]] %s839_s14  ;;  %s841_s15 = spop %840 }
 0x167   :  { %803 = sst [smem:[#allocation8 + $0x2]] %s841_s15 }
 0x168   :  { %888 = shalt.err (!%p885_p13)
}
 0x169   :  { %s899_s23 = smov [#allocation8]  }
 0x16a   :  { %811 = dma.smem_to_hbm %s899_s23, 16, %s1157_s2, [#allocation6]  }
 0x16b   :  { %893 = dma.done.wait [#allocation6], 16  }
 0x16c   :  { %894 = vsyncadd [#allocation6], 4294967280 }
 0x16d   :  { %815 = sfence }
 0x16e   :  { %816 = vsyncpa [#allocation4], 1 }
 0x16f   :  { %817 = vsyncpa [#allocation5], 1 }
 0x170   :  { %818 = vsyncpa [#allocation6], 1 }

</bundles_post_ra>
